<compile_context>
chip_gen: v7x
topology: tpu7x:2x2x1
jax: 0.10.0
libtpu: 0.0.40
codegen_flags: <defaults>
</compile_context>

<pallas_src>
import functools

import jax
import jax.numpy as jnp
from jax.experimental import pallas as pl
from jax.experimental.pallas import tpu as pltpu


def autopad(k, p=None, d=1):
    """Pad to 'same' shape outputs (square kernels)."""
    if d > 1:
        k = d * (k - 1) + 1
    if p is None:
        p = k // 2
    return p


def _round_up(x, m):
    return ((x + m - 1) // m) * m


def _pick_tile(dim_padded, candidates=(512, 256, 128)):
    for t in candidates:
        if dim_padded % t == 0:
            return t
    return dim_padded


def _im2col(x, kh, kw, s, p, d):
    """x: [B, C, H, W] -> A: [B*Ho*Wo, C*kh*kw] (channel-major, then kh, kw)."""
    B, C, H, W = x.shape
    Ho = (H + 2 * p - d * (kh - 1) - 1) // s + 1
    Wo = (W + 2 * p - d * (kw - 1) - 1) // s + 1
    xp = jnp.pad(x, ((0, 0), (0, 0), (p, p), (p, p)))
    cols = []
    for i in range(kh):
        for j in range(kw):
            patch = xp[:, :,
                       i * d: i * d + (Ho - 1) * s + 1: s,
                       j * d: j * d + (Wo - 1) * s + 1: s]  # [B, C, Ho, Wo]
            cols.append(patch)
    col = jnp.stack(cols, axis=2)                   # [B, C, kh*kw, Ho, Wo]
    col = col.reshape(B, C * kh * kw, Ho * Wo)      # index = c*kh*kw + i*kw + j
    col = col.transpose(0, 2, 1).reshape(B * Ho * Wo, C * kh * kw)
    return col, Ho, Wo


def _matmul_bn_act_kernel(a_ref, w_ref, scale_ref, bias_ref, o_ref, acc_ref,
                          *, apply_silu):
    k = pl.program_id(2)

    @pl.when(k == 0)
    def _init():
        acc_ref[...] = jnp.zeros_like(acc_ref)

    acc_ref[...] += jnp.dot(a_ref[...], w_ref[...],
                            preferred_element_type=jnp.float32)

    @pl.when(k == pl.num_programs(2) - 1)
    def _finalize():
        y = acc_ref[...] * scale_ref[...] + bias_ref[...]
        if apply_silu:
            y = y * (1.0 / (1.0 + jnp.exp(-y)))   # SiLU
        o_ref[...] = y.astype(o_ref.dtype)


def conv_bn_silu(x, conv_w, bn_gamma, bn_beta, bn_mean, bn_var, *,
                 stride=1, padding=None, dilation=1, groups=1, eps=1e-5,
                 act=True):
    """Pallas equivalent of ultralytics Conv.forward (inference-mode BN)."""
    if groups != 1:
        # TODO(synk): grouped conv not supported; module default is g=1.
        raise NotImplementedError("groups != 1 not implemented")

    B, C1, H, W = x.shape
    C2, C1w, kh, kw = conv_w.shape
    assert C1 == C1w, "channel mismatch"
    p = autopad(kh, padding, dilation)

    # im2col + weight reshape (conv -> matmul).
    A, Ho, Wo = _im2col(x, kh, kw, stride, p, dilation)    # [M, K]
    M, K = A.shape
    Wmat = conv_w.reshape(C2, K).T.astype(x.dtype)         # [K, C2]

    # Fold BatchNorm (running stats) into per-channel scale/bias.
    scale = (bn_gamma / jnp.sqrt(bn_var + eps)).astype(jnp.float32)
    bias = (bn_beta - bn_mean * scale).astype(jnp.float32)

    # Pad to TPU-friendly extents (sublane multiple of 8, lane multiple of 128).
    TM = 256
    Mp = _round_up(M, TM)
    Kp = _round_up(K, 128)
    Np = _round_up(C2, 128)
    TK = _pick_tile(Kp)
    TN = _pick_tile(Np)

    A_p = jnp.zeros((Mp, Kp), x.dtype).at[:M, :K].set(A)
    W_p = jnp.zeros((Kp, Np), x.dtype).at[:K, :C2].set(Wmat)
    scale_p = jnp.zeros((1, Np), jnp.float32).at[0, :C2].set(scale)
    bias_p = jnp.zeros((1, Np), jnp.float32).at[0, :C2].set(bias)

    grid = (Mp // TM, Np // TN, Kp // TK)
    kernel = functools.partial(_matmul_bn_act_kernel, apply_silu=bool(act))

    out_p = pl.pallas_call(
        kernel,
        out_shape=jax.ShapeDtypeStruct((Mp, Np), x.dtype),
        grid_spec=pltpu.PrefetchScalarGridSpec(
            num_scalar_prefetch=0,
            grid=grid,
            in_specs=[
                pl.BlockSpec((TM, TK), lambda i, j, k: (i, k)),   # patches
                pl.BlockSpec((TK, TN), lambda i, j, k: (k, j)),   # weights
                pl.BlockSpec((1, TN), lambda i, j, k: (0, j)),    # bn scale
                pl.BlockSpec((1, TN), lambda i, j, k: (0, j)),    # bn bias
            ],
            out_specs=pl.BlockSpec((TM, TN), lambda i, j, k: (i, j)),
            scratch_shapes=[pltpu.VMEM((TM, TN), jnp.float32)],
        ),
        compiler_params=pltpu.CompilerParams(
            dimension_semantics=("parallel", "parallel", "arbitrary"),
        ),
    )(A_p, W_p, scale_p, bias_p)

    out = out_p[:M, :C2].reshape(B, Ho, Wo, C2).transpose(0, 3, 1, 2)
    return out


def _reference(x, w, gamma, beta, mean, var, stride, padding, dilation,
               eps=1e-5):
    y = jax.lax.conv_general_dilated(
        x, w, window_strides=(stride, stride),
        padding=[(padding, padding), (padding, padding)],
        rhs_dilation=(dilation, dilation),
        dimension_numbers=("NCHW", "OIHW", "NCHW"))
    s = gamma / jnp.sqrt(var + eps)
    b = beta - mean * s
    y = y * s[None, :, None, None] + b[None, :, None, None]
    return y * jax.nn.sigmoid(y)


if __name__ == "__main__":
    key = jax.random.PRNGKey(0)
    k0, k1, k2, k3, k4, k5, k6 = jax.random.split(key, 7)

    B, C1, C2, H, W = 2, 4, 8, 16, 16
    x = jax.random.normal(k0, (B, C1, H, W), dtype=jnp.float32)

    gamma = 1.0 + 0.1 * jax.random.normal(k2, (C2,), dtype=jnp.float32)
    beta = 0.1 * jax.random.normal(k3, (C2,), dtype=jnp.float32)
    mean = 0.1 * jax.random.normal(k4, (C2,), dtype=jnp.float32)
    var = jax.nn.softplus(jax.random.normal(k5, (C2,), dtype=jnp.float32)) + 0.5

    # Case 1: module defaults  Conv(c1=4, c2=8, k=1, s=1) -> p=0, d=1, g=1, SiLU.
    w1 = 0.1 * jax.random.normal(k1, (C2, C1, 1, 1), dtype=jnp.float32)
    out1 = conv_bn_silu(x, w1, gamma, beta, mean, var, stride=1)
    out1 = jax.block_until_ready(out1)
    ref1 = _reference(x, w1, gamma, beta, mean, var, 1, 0, 1)
    assert out1.shape == ref1.shape
    assert jnp.allclose(out1, ref1, atol=2e-3, rtol=2e-3), \
        float(jnp.max(jnp.abs(out1 - ref1)))

    # Case 2: Conv(c1=4, c2=8, k=3, s=2) -> p=1 ('same'-style), exercises im2col.
    w3 = 0.1 * jax.random.normal(k6, (C2, C1, 3, 3), dtype=jnp.float32)
    out2 = conv_bn_silu(x, w3, gamma, beta, mean, var, stride=2)
    out2 = jax.block_until_ready(out2)
    ref2 = _reference(x, w3, gamma, beta, mean, var, 2, autopad(3), 1)
    assert out2.shape == ref2.shape
    assert jnp.allclose(out2, ref2, atol=2e-3, rtol=2e-3), \
        float(jnp.max(jnp.abs(out2 - ref2)))

    print("KERNEL_OK")
</pallas_src>

<mosaic_0001>
module attributes {stable_mosaic.version = 11 : i64} {
  func.func @_matmul_bn_act_kernel(%arg0: i32, %arg1: i32, %arg2: i32, %arg3: memref<256x128xf32, #tpu.memory_space<vmem>>, %arg4: memref<128x128xf32, #tpu.memory_space<vmem>>, %arg5: memref<1x128xf32, #tpu.memory_space<vmem>>, %arg6: memref<1x128xf32, #tpu.memory_space<vmem>>, %arg7: memref<256x128xf32, #tpu.memory_space<vmem>>, %arg8: memref<256x128xf32, #tpu.memory_space<vmem>>) attributes {dimension_semantics = [#tpu.dimension_semantics<parallel>, #tpu.dimension_semantics<parallel>, #tpu.dimension_semantics<arbitrary>], iteration_bounds = array<i64: 2, 1, 1>, scalar_prefetch = 0 : i64, scratch_operands = 1 : i64, tpu.core_type = #tpu.core_type<tc>, window_params = [{transform_indices = @transform_0, window_bounds = array<i64: 256, 128>}, {transform_indices = @transform_1, window_bounds = array<i64: 128, 128>}, {transform_indices = @transform_2, window_bounds = array<i64: 1, 128>}, {transform_indices = @transform_3, window_bounds = array<i64: 1, 128>}, {transform_indices = @transform_4, window_bounds = array<i64: 256, 128>}]} {
    %c0_i32 = arith.constant 0 : i32
    %0 = arith.cmpi eq, %arg2, %c0_i32 : i32
    %1 = arith.extui %0 : i1 to i32
    %c0_i32_0 = arith.constant 0 : i32
    %2 = arith.cmpi ne, %1, %c0_i32_0 : i32
    scf.if %2 {
      %cst_10 = arith.constant 0.000000e+00 : f32
      %12 = vector.broadcast %cst_10 : f32 to vector<256x128xf32>
      %c0_11 = arith.constant 0 : index
      %c0_12 = arith.constant 0 : index
      %13 = vector.load %arg8[%c0_11, %c0_12] : memref<256x128xf32, #tpu.memory_space<vmem>>, vector<256x128xf32>
      tpu.vector_store %arg8[%c0_11, %c0_12], %12 {strides = array<i32>} : memref<256x128xf32, #tpu.memory_space<vmem>>, vector<256x128xf32>,
    } else {
    }
    %c0 = arith.constant 0 : index
    %c0_1 = arith.constant 0 : index
    %3 = vector.load %arg8[%c0, %c0_1] : memref<256x128xf32, #tpu.memory_space<vmem>>, vector<256x128xf32>
    %c0_2 = arith.constant 0 : index
    %c0_3 = arith.constant 0 : index
    %4 = vector.load %arg3[%c0_2, %c0_3] : memref<256x128xf32, #tpu.memory_space<vmem>>, vector<256x128xf32>
    %c0_4 = arith.constant 0 : index
    %c0_5 = arith.constant 0 : index
    %5 = vector.load %arg4[%c0_4, %c0_5] : memref<128x128xf32, #tpu.memory_space<vmem>>, vector<128x128xf32>
    %cst = arith.constant dense<0.000000e+00> : vector<256x128xf32>
    %6 = tpu.matmul %4, %5, %cst {dimension_numbers = #tpu.dot_dimension_numbers<[1], [0], [0], [1], [0, 0, 1, 1], [], []>} : vector<256x128xf32>, vector<128x128xf32>, vector<256x128xf32> -> vector<256x128xf32>
    %7 = arith.addf %3, %6 : vector<256x128xf32>
    %c0_6 = arith.constant 0 : index
    %c0_7 = arith.constant 0 : index
    %8 = vector.load %arg8[%c0_6, %c0_7] : memref<256x128xf32, #tpu.memory_space<vmem>>, vector<256x128xf32>
    tpu.vector_store %arg8[%c0_6, %c0_7], %7 {strides = array<i32>} : memref<256x128xf32, #tpu.memory_space<vmem>>, vector<256x128xf32>,
    %c0_i32_8 = arith.constant 0 : i32
    %9 = arith.cmpi eq, %arg2, %c0_i32_8 : i32
    %10 = arith.extui %9 : i1 to i32
    %c0_i32_9 = arith.constant 0 : i32
    %11 = arith.cmpi ne, %10, %c0_i32_9 : i32
    scf.if %11 {
      %c0_10 = arith.constant 0 : index
      %c0_11 = arith.constant 0 : index
      %12 = vector.load %arg8[%c0_10, %c0_11] : memref<256x128xf32, #tpu.memory_space<vmem>>, vector<256x128xf32>
      %c0_12 = arith.constant 0 : index
      %c0_13 = arith.constant 0 : index
      %13 = vector.load %arg5[%c0_12, %c0_13] : memref<1x128xf32, #tpu.memory_space<vmem>>, vector<1x128xf32>
      %14 = vector.broadcast %13 : vector<1x128xf32> to vector<256x128xf32>
      %15 = arith.mulf %12, %14 : vector<256x128xf32>
      %c0_14 = arith.constant 0 : index
      %c0_15 = arith.constant 0 : index
      %16 = vector.load %arg6[%c0_14, %c0_15] : memref<1x128xf32, #tpu.memory_space<vmem>>, vector<1x128xf32>
      %17 = vector.broadcast %16 : vector<1x128xf32> to vector<256x128xf32>
      %18 = arith.addf %15, %17 : vector<256x128xf32>
      %cst_16 = arith.constant 0.000000e+00 : f32
      %19 = vector.broadcast %cst_16 : f32 to vector<256x128xf32>
      %20 = arith.subf %19, %18 : vector<256x128xf32>
      %21 = math.exp %20 : vector<256x128xf32>
      %cst_17 = arith.constant 1.000000e+00 : f32
      %22 = vector.broadcast %cst_17 : f32 to vector<256x128xf32>
      %23 = arith.addf %22, %21 : vector<256x128xf32>
      %cst_18 = arith.constant 1.000000e+00 : f32
      %24 = vector.broadcast %cst_18 : f32 to vector<256x128xf32>
      %25 = arith.divf %24, %23 : vector<256x128xf32>
      %26 = arith.mulf %18, %25 : vector<256x128xf32>
      %c0_19 = arith.constant 0 : index
      %c0_20 = arith.constant 0 : index
      %27 = vector.load %arg7[%c0_19, %c0_20] : memref<256x128xf32, #tpu.memory_space<vmem>>, vector<256x128xf32>
      tpu.vector_store %arg7[%c0_19, %c0_20], %26 {strides = array<i32>} : memref<256x128xf32, #tpu.memory_space<vmem>>, vector<256x128xf32>,
    } else {
    }
    return
  }
  func.func @transform_0(%arg0: i32, %arg1: i32, %arg2: i32) -> (i32, i32) {
    %c0_i32 = arith.constant 0 : i32
    return %arg0, %arg2 : i32, i32
  }
  func.func @transform_1(%arg0: i32, %arg1: i32, %arg2: i32) -> (i32, i32) {
    %c0_i32 = arith.constant 0 : i32
    return %arg2, %arg1 : i32, i32
  }
  func.func @transform_2(%arg0: i32, %arg1: i32, %arg2: i32) -> (i32, i32) {
    %c0_i32 = arith.constant 0 : i32
    %c0_i32_0 = arith.constant 0 : i32
    return %c0_i32, %arg1 : i32, i32
  }
  func.func @transform_3(%arg0: i32, %arg1: i32, %arg2: i32) -> (i32, i32) {
    %c0_i32 = arith.constant 0 : i32
    %c0_i32_0 = arith.constant 0 : i32
    return %c0_i32, %arg1 : i32, i32
  }
  func.func @transform_4(%arg0: i32, %arg1: i32, %arg2: i32) -> (i32, i32) {
    %c0_i32 = arith.constant 0 : i32
    return %arg0, %arg1 : i32, i32
  }
}

</mosaic_0001>

<bundles_post_ra>
// kernel: tpu_custom_call.1
= control target key start
LH: loop header
LB: loop body
LE: loop exit
PB: predicated region body
PF: predicated region fallthrough
CT: control target
= control target key end

     0   :  { %9 = vsyncpa [#allocation4], 0  ;;  %s2318_s0 = inlined_call_operand.hbm [shape: f32[512,128], index: 0, kind: input, shape index: {}]   ;;  %s2319_s1 = inlined_call_operand.hbm [shape: f32[128,128], index: 1, kind: input, shape index: {}]   ;;  %s2320_s2 = inlined_call_operand.vmem [shape: f32[1,128], index: 2, kind: input, shape index: {}]   ;;  %s2321_s3 = inlined_call_operand.vmem [shape: f32[1,128], index: 3, kind: input, shape index: {}]   ;;  %s2322_s4 = inlined_call_operand.hbm [shape: f32[512,128], index: 4, kind: output, shape index: {}]  }
   0x1   :  { %11 = vsyncpa [#allocation4 + $0x1], 0 }
   0x2   :  { %12 = vsyncpa [#allocation7], 0 }
   0x3   :  { %13 = vsyncpa [#allocation5], 0 }
   0x4   :  { %15 = vsyncpa [#allocation5 + $0x1], 0  ;;  %s1794_s15 = smov 0   ;;  %s1796_s16 = smov 0  }
   0x5   :  { %s1798_s17 = smov 0   ;;  %s1800_s18 = smov 0  }
   0x6   :  { %s1802_s19 = smov 0   ;;  %s1804_s20 = smov 0  }
   0x7 LB: > { %s1212_s21 = sadd.s32 4294967295, %s1760_s20   ;;  %s1213_s22 = sadd.s32 4294967294, %s1760_s20   ;;  %s1760_s20 = sphi %s1804_s20, %s21_s20   ;;  %s1756_s19 = sphi %s1802_s19, %s2346_s19   ;;  %s1752_s18 = sphi %s1800_s18, %s2345_s18   ;;  %s1748_s17 = sphi %s1798_s17, %s2344_s17   ;;  %s1744_s16 = sphi %s1796_s16, %s2343_s16   ;;  %s1740_s15 = sphi %s1794_s15, %s2342_s15  }
   0x8   : > { %p62_p0 = scmp.ne.s32.totalorder %s1744_s16, %s1740_s15  ;;  %p1828_p1 = scmp.eq.s32.totalorder %s1212_s21, 0 }
   0x9   : > { %p1832_p2 = scmp.eq.s32.totalorder %s1212_s21, 1  ;;  %p174_p3 = scmp.eq.s32.totalorder %s1213_s22, 1 }
   0xa   : > { %s2327_s23 = scalar_select %p1828_p1, 1, 0 }
   0xb   : > { %s2328_s24 = scalar_select %p1832_p2, 1, 0 }
   0xc   : > { %p1838_p4 = por %p1828_p1, %p62_p0  ;;  %p1214_p5 = scmp.ge.s32.totalorder %s1760_s20, 1 }
   0xd   : > { %p1843_p6 = por %p174_p3, %p62_p0  ;;  %p181_p7 = scmp.lt.s32.totalorder %s1760_s20, 3 }
   0xe   : > { %s2329_s25 = scalar_select %p1838_p4, 1, 0 }
   0xf   : > { %s2330_s26 = scalar_select %p1843_p6, 1, 0 }
  0x10   : > { %p1848_p8 = pnand %p1214_p5, %p181_p7  ;;  %s1762_s28 = smov [#allocation6]  }
  0x11   : > { %s197_s29 = sshll.u32 %s1762_s28, 4  ;;  %s40_s5 = sadd.s32 1, %s1756_s19  ;;  %s198_s29 = int_to_ptr.vmem [resolvable:$true] %s197_s29 }
  0x12   : > { %s2331_s27 = scalar_select %p1848_p8, 1, 0 }
  0x13   : > { %p1419_p9 = pneg %p1848_p8  ;;  %s1616_s8 = scalar_lea.hbm %s2319_s1, 2048 }
  0x14   : > { %p1617_p12 = scmp.ne.s32.totalorder %s2319_s1, %s1616_s8  ;;  %p1623_p5 = scmp.lt.u32.totalorder %s1616_s8, %s2319_s1 }
  0x15   : > { %p1857_p11 = pnand %p1419_p9, %p1828_p1 }
  0x17   : > { %p1618_p13 = pneg %p1857_p11 }
  0x19   : > { %p1619_p0 = pnand %p1618_p13, %p1617_p12 }
  0x1b   : > { %p1620_p3 = pneg %p1619_p0 }
  0x1d   : > { %p1625_p7 = pnand %p1623_p5, %p1620_p3 }
  0x1f   : > { %1628 = shalt.err (!%p1625_p7)
}
  0x20   : > { %s1629_s13 = scalar_lea.vmem %s198_s29, 2048  ;;  %p1637_p1 = scmp.lt.s32.totalorder %s198_s29, %s198_s29 }
  0x21   : > { %p1630_p9 = scmp.ne.s32.totalorder %s198_s29, %s1629_s13  ;;  %p1638_p4 = scmp.lt.s32.totalorder %s1629_s13, %s1629_s13 }
  0x23   : > { %p1632_p10 = pnand %p1630_p9, %p1618_p13  ;;  %p1639_p8 = por %p1638_p4, %p1637_p1 }
  0x25   : > { %p1633_p6 = pneg %p1632_p10 }
  0x27   : > { %p1640_p2 = pnand %p1639_p8, %p1633_p6 }
  0x29   : > { %1643 = shalt.err (!%p1640_p2)
}
  0x2a   : > { %s1763_s14 = smov 128   ;;  %s1764_s21 = smov 8  }
  0x2b   : > { %1422 = dma.hbm_to_vmem [thread:$0]  (!%p1857_p11), %s2319_s1, 2048, %s198_s29, [#allocation7], %s1763_s14, %s1763_s14, %s1764_s21  }
  0x2c   : > { %p42_p1 = scmp.ge.s32.totalorder %s40_s5, 2  ;;  %s49_s6 = sadd.s32 1, %s1748_s17 }
  0x2d   : > { %p56_p2 = scmp.ne.s32.totalorder %s1748_s17, %s1744_s16  ;;  %p57_p4 = scmp.eq.s32.totalorder %s1760_s20, 0 }
  0x2e   : > { %s2348_s5 = smov (%p42_p1, %s40_s5), 0  ;;  %p2334_p8 = scmp.ne.s32.totalorder %s2328_s24, 0 }
  0x2f   : > { %p1887_p6 = por %p57_p4, %p56_p2  ;;  %s44_s8 = ssub.s32 %s1756_s19, %s2348_s5 }
  0x30   : > { %p1893_p10 = por %p2334_p8, %p56_p2  ;;  %p1432_p12 = scmp.lt.s32.totalorder %s1760_s20, 2 }
  0x31   : > { %p47_p11 = scmp.eq.s32.totalorder %s44_s8, 0  ;;  %s223_s29 = sand.u32 1, %s1748_s17  }
  0x32   : > { %s1219_s9 = sshll.u32 %s223_s29, 8  ;;  %s1233_s11 = sshll.u32 %s1756_s19, 12 }
  0x33   : > { %s1902_s10 = scalar_select %p47_p11, %s1748_s17, %s49_s6  }
  0x34   : > { %s1908_s22 = scalar_lea.hbm %s2318_s0, %s1233_s11  ;;  %s227_s24 = scalar_lea.vmem [#allocation3], %s1219_s9 }
  0x35   : > { %s235_s28 = sshll.u32 %s227_s24, 4  ;;  %p1914_p13 = pnand %p1432_p12, %p1887_p6  ;;  %s1910_s28 = int_to_ptr.vmem [resolvable:$true] %s235_s28 }
  0x36   : > { %s1918_s6 = scalar_lea.sflag [#allocation4], %s223_s29  ;;  %s1644_s12 = scalar_lea.hbm %s1908_s22, 4096 }
  0x37   : > { %p1645_p0 = scmp.ne.s32.totalorder %s1908_s22, %s1644_s12  ;;  %p1646_p3 = pneg %p1914_p13 }
  0x38   : > { %s1649_s7 = scalar_lea.hbm %s2318_s0, 8192  ;;  %p1650_p9 = scmp.lt.u32.totalorder %s1908_s22, %s2318_s0 }
  0x39   : > { %p1647_p5 = pnand %p1646_p3, %p1645_p0  ;;  %p1651_p1 = scmp.lt.u32.totalorder %s1649_s7, %s1644_s12 }
  0x3a   : > { %p1653_p4 = scmp.lt.u32.totalorder %s1644_s12, %s1908_s22 }
  0x3b   : > { %p1648_p7 = pneg %p1647_p5  ;;  %p1652_p2 = por %p1651_p1, %p1650_p9 }
  0x3d   : > { %p1654_p6 = por %p1653_p4, %p1652_p2 }
  0x3f   : > { %p1655_p8 = pnand %p1654_p6, %p1648_p7 }
  0x41   : > { %1658 = shalt.err (!%p1655_p8)
}
  0x42   : > { %s1659_s29 = scalar_lea.vmem %s1910_s28, 4096  ;;  %s1765_s9 = smov [#allocation3]  }
  0x43   : > { %p1660_p12 = scmp.ne.s32.totalorder %s1910_s28, %s1659_s29  ;;  %s1664_s11 = sshll.u32 %s1765_s9, 4  ;;  %s1665_s11 = int_to_ptr.vmem [resolvable:$false] %s1664_s11 }
  0x44   : > { %s1666_s13 = scalar_lea.vmem %s1665_s11, 8192  ;;  %p1667_p5 = scmp.lt.s32.totalorder %s1910_s28, %s1665_s11 }
  0x45   : > { %p1662_p11 = pnand %p1660_p12, %p1646_p3  ;;  %p1668_p9 = scmp.lt.s32.totalorder %s1666_s13, %s1659_s29 }
  0x47   : > { %p1663_p0 = pneg %p1662_p11  ;;  %p1669_p1 = por %p1668_p9, %p1667_p5 }
  0x49   : > { %p1670_p2 = pnand %p1669_p1, %p1663_p0 }
  0x4b   : > { %1673 = shalt.err (!%p1670_p2)
}
  0x4c   : > { %1426 = dma.hbm_to_vmem [thread:$0]  (!%p1914_p13), %s1908_s22, 4096, %s1910_s28, %s1918_s6, %s1763_s14, %s1763_s14, %s1764_s21  }
  0x4d   : > { %p2337_p3 = scmp.ne.s32.totalorder %s2331_s27, 0 }
  0x4e   : > { %s1952_s12 = sand.u32 (!%p2337_p3), 1, %s1744_s16   ;;  %p2338_p7 = scmp.ne.s32.totalorder (!%p2337_p3), %s2329_s25, 0 }
  0x4f   : > { %247 = sbr.rel (%p2337_p3) target bundleno = 444 (0x1bc), region = 36  ;;  %s1223_s7 = sshll.u32 (!%p2337_p3), %s1952_s12, 8 }
  0x50   : > { %s250_s24 = scalar_lea.sflag (!%p2337_p3), [#allocation4], %s1952_s12  ;;  %s1958_s8 = scalar_lea.vmem (!%p2337_p3), [#allocation3], %s1223_s7 }
  0x56   : > { %1727 = dma.done.wait (%p2338_p7), %s250_s24, 4096  }
  0x57   : > { %1729 = vsyncadd (%p2338_p7), %s250_s24, 4294963200  ;;  %p2339_p13 = scmp.ne.s32.totalorder %s2327_s23, 0 }
  0x59   : > { %1731 = dma.done.wait (%p2339_p13), [#allocation7], 2048  }
  0x5a   : > { %1733 = vsyncadd (%p2339_p13), [#allocation7], 4294965248  ;;  %v397_v0 = vld [vmem:[#allocation6] sm:$0xff]  ;;  %v398_v1 = vld [vmem:[#allocation6 + $0x8] sm:$0xff]  ;;  %s2144_s21 = scalar_lea.vmem [#allocation8], %s1223_s7  ;;  %s1234_s22 = sshll.u32 %s1752_s18, 12 }
  0x5b   : > { %v399_v2 = vld [vmem:[#allocation6 + $0x10] sm:$0xff]  ;;  %v1363_v3 = vpack.c.bf16 %v398_v1, %v397_v0  ;;  %v400_v4 = vld [vmem:[#allocation6 + $0x18] sm:$0xff]  ;;  %v401_v6 = vld [vmem:[#allocation6 + $0x20] sm:$0xff]  ;;  %s1086_s28 = sshll.u32 %s2144_s21, 4  ;;  %s2263_s18 = scalar_lea.hbm %s2322_s4, %s1234_s22  ;;  %s2265_s28 = int_to_ptr.vmem [resolvable:$true] %s1086_s28 }
  0x5c   : > { %v1367_v5 = vpack.c.bf16 %v400_v4, %v399_v2  ;;  %v402_v7 = vld [vmem:[#allocation6 + $0x28] sm:$0xff]  ;;  %v365_v9 = vld [vmem:[%s1958_s8] sm:$0xff]  ;;  %v403_v11 = vld [vmem:[#allocation6 + $0x30] sm:$0xff]  ;;  %s1072_s9 = scalar_lea.sflag [#allocation5], %s1952_s12  ;;  %s1674_s11 = scalar_lea.vmem %s2265_s28, 4096 }
  0x5d   : > { %1364 = vmatprep.subr.bf16.mxu0 %v1363_v3  ;;  %1395 = vmatprep.subr.bf16.mxu1 %v1363_v3  ;;  %v1371_v8 = vpack.c.bf16 %v402_v7, %v401_v6  ;;  %v381_v10 = vld [vmem:[%s1958_s8 + $0x80] sm:$0xff]  ;;  %v404_v12 = vld [vmem:[#allocation6 + $0x38] sm:$0xff]  ;;  %v406_v15 = vld [vmem:[#allocation6 + $0x48] sm:$0xff]  ;;  %p1675_p4 = scmp.ne.s32.totalorder %s2265_s28, %s1674_s11  ;;  %s1766_s13 = smov [#allocation8]  }
  0x5e   : > { %1366 = vmatpush3.bf16.msra.mxu0 %v1363_v3  ;;  %1403 = vmatpush3.bf16.msra.mxu1 %v1363_v3  ;;  %v1375_v13 = vpack.c.bf16 %v404_v12, %v403_v11  ;;  %v405_v14 = vld [vmem:[#allocation6 + $0x40] sm:$0xff]  ;;  %v407_v17 = vld [vmem:[#allocation6 + $0x50] sm:$0xff]  ;;  %v408_v18 = vld [vmem:[#allocation6 + $0x58] sm:$0xff]  ;;  %s1678_s7 = sshll.u32 %s1766_s13, 4  ;;  %s1679_s7 = int_to_ptr.vmem [resolvable:$false] %s1678_s7 }
  0x5f   : > { %1368 = vmatprep.subr.bf16.mxu0 %v1367_v5  ;;  %1396 = vmatprep.subr.bf16.mxu1 %v1367_v5  ;;  %v1379_v16 = vpack.c.bf16 %v406_v15, %v405_v14  ;;  %v1383_v19 = vpack.c.bf16 %v408_v18, %v407_v17  ;;  %v409_v20 = vld [vmem:[#allocation6 + $0x60] sm:$0xff]  ;;  %v410_v21 = vld [vmem:[#allocation6 + $0x68] sm:$0xff]  ;;  %v411_v23 = vld [vmem:[#allocation6 + $0x70] sm:$0xff]  ;;  %p1676_p6 = pnand %p1675_p4, %p1893_p10  ;;  %s1680_s24 = scalar_lea.vmem %s1679_s7, 8192 }
  0x60   : > { %1315 = vmatprep.mubr.f32.mxu0 %v365_v9  ;;  %1339 = vmatprep.mubr.f32.mxu1 %v381_v10  ;;  %v1387_v22 = vpack.c.bf16 %v410_v21, %v409_v20  ;;  %v412_v24 = vld [vmem:[#allocation6 + $0x78] sm:$0xff]  ;;  %v366_v26 = vld [vmem:[%s1958_s8 + $0x8] sm:$0xff]  ;;  %v367_v28 = vld [vmem:[%s1958_s8 + $0x10] sm:$0xff]  ;;  %p1681_p12 = scmp.lt.s32.totalorder %s2265_s28, %s1679_s7  ;;  %p1682_p11 = scmp.lt.s32.totalorder %s1680_s24, %s1674_s11 }
  0x61   : > { %v1391_v25 = vpack.c.bf16 %v412_v24, %v411_v23  ;;  %v382_v27 = vld [vmem:[%s1958_s8 + $0x88] sm:$0xff]  ;;  %v383_v29 = vld [vmem:[%s1958_s8 + $0x90] sm:$0xff]  ;;  %v368_v30 = vld [vmem:[%s1958_s8 + $0x18] sm:$0xff]  ;;  %p1677_p8 = pneg %p1676_p6 }
  0x62   : > { %1370 = vmatpush3.bf16.msra.mxu0 %v1367_v5  ;;  %1404 = vmatpush3.bf16.msra.mxu1 %v1367_v5  ;;  %v384_v31 = vld [vmem:[%s1958_s8 + $0x98] sm:$0xff]  ;;  %v369_v32 = vld [vmem:[%s1958_s8 + $0x20] sm:$0xff]  ;;  %v370_v34 = vld [vmem:[%s1958_s8 + $0x28] sm:$0xff]  ;;  %p1683_p0 = por %p1682_p11, %p1681_p12 }
  0x63   : > { %1372 = vmatprep.subr.bf16.mxu0 %v1371_v8  ;;  %1397 = vmatprep.subr.bf16.mxu1 %v1371_v8  ;;  %v385_v33 = vld [vmem:[%s1958_s8 + $0xa0] sm:$0xff]  ;;  %v386_v35 = vld [vmem:[%s1958_s8 + $0xa8] sm:$0xff]  ;;  %v371_v36 = vld [vmem:[%s1958_s8 + $0x30] sm:$0xff] }
  0x64   : > { %v387_v37 = vld [vmem:[%s1958_s8 + $0xb0] sm:$0xff]  ;;  %v372_v38 = vld [vmem:[%s1958_s8 + $0x38] sm:$0xff]  ;;  %v373_v40 = vld [vmem:[%s1958_s8 + $0x40] sm:$0xff]  ;;  %p1684_p5 = pnand %p1683_p0, %p1677_p8 }
  0x65   : > { %v388_v39 = vld [vmem:[%s1958_s8 + $0xb8] sm:$0xff]  ;;  %v389_v41 = vld [vmem:[%s1958_s8 + $0xc0] sm:$0xff]  ;;  %v374_v42 = vld [vmem:[%s1958_s8 + $0x48] sm:$0xff] }
  0x66   : > { %1374 = vmatpush3.bf16.msra.mxu0 %v1371_v8  ;;  %1405 = vmatpush3.bf16.msra.mxu1 %v1371_v8  ;;  %v390_v43 = vld [vmem:[%s1958_s8 + $0xc8] sm:$0xff]  ;;  %v375_v44 = vld [vmem:[%s1958_s8 + $0x50] sm:$0xff]  ;;  %v376_v46 = vld [vmem:[%s1958_s8 + $0x58] sm:$0xff] }
  0x67   : > { %1376 = vmatprep.subr.bf16.mxu0 %v1375_v13  ;;  %1398 = vmatprep.subr.bf16.mxu1 %v1375_v13  ;;  %v391_v45 = vld [vmem:[%s1958_s8 + $0xd0] sm:$0xff]  ;;  %v392_v47 = vld [vmem:[%s1958_s8 + $0xd8] sm:$0xff]  ;;  %v377_v48 = vld [vmem:[%s1958_s8 + $0x60] sm:$0xff] }
  0x68   : > { %v393_v49 = vld [vmem:[%s1958_s8 + $0xe0] sm:$0xff]  ;;  %v378_v50 = vld [vmem:[%s1958_s8 + $0x68] sm:$0xff]  ;;  %v379_v52 = vld [vmem:[%s1958_s8 + $0x70] sm:$0xff] }
  0x69   : > { %v394_v51 = vld [vmem:[%s1958_s8 + $0xe8] sm:$0xff]  ;;  %v395_v53 = vld [vmem:[%s1958_s8 + $0xf0] sm:$0xff]  ;;  %v380_v54 = vld [vmem:[%s1958_s8 + $0x78] sm:$0xff] }
  0x6a   : > { %1378 = vmatpush3.bf16.msra.mxu0 %v1375_v13  ;;  %1406 = vmatpush3.bf16.msra.mxu1 %v1375_v13  ;;  %v396_v55 = vld [vmem:[%s1958_s8 + $0xf8] sm:$0xff]  ;;  %v2003_v56 = vld [vmem:[%s2320_s2] ss:$0 sm:$0xff] }
  0x6b   : > { %1380 = vmatprep.subr.bf16.mxu0 %v1379_v16  ;;  %1399 = vmatprep.subr.bf16.mxu1 %v1379_v16  ;;  %v2008_v58 = vld [vmem:[%s2321_s3] ss:$0 sm:$0xff] }
  0x6e   : > { %1382 = vmatpush3.bf16.msra.mxu0 %v1379_v16  ;;  %1407 = vmatpush3.bf16.msra.mxu1 %v1379_v16 }
  0x6f   : > { %1384 = vmatprep.subr.bf16.mxu0 %v1383_v19  ;;  %1400 = vmatprep.subr.bf16.mxu1 %v1383_v19 }
  0x72   : > { %1386 = vmatpush3.bf16.msra.mxu0 %v1383_v19  ;;  %1408 = vmatpush3.bf16.msra.mxu1 %v1383_v19 }
  0x73   : > { %1388 = vmatprep.subr.bf16.mxu0 %v1387_v22  ;;  %1401 = vmatprep.subr.bf16.mxu1 %v1387_v22 }
  0x76   : > { %1390 = vmatpush3.bf16.msra.mxu0 %v1387_v22  ;;  %1409 = vmatpush3.bf16.msra.mxu1 %v1387_v22 }
  0x77   : > { %1392 = vmatprep.subr.bf16.mxu0 %v1391_v25  ;;  %1402 = vmatprep.subr.bf16.mxu1 %v1391_v25 }
  0x7a   : > { %1394 = vmatpush3.bf16.msra.mxu0 %v1391_v25  ;;  %1410 = vmatpush3.bf16.msra.mxu1 %v1391_v25 }
  0x7d   : > { %1316 = vmatmul.mubr.f32.vlgmr.msra.gmra.mrb[0].mxu0 %v366_v26  ;;  %1340 = vmatmul.mubr.f32.vlgmr.msra.gmra.mrb[0].mxu1 %v382_v27 }
  0x7e   : > { %1318 = vmatprep.mubr.f32.mxu0 %v367_v28  ;;  %1342 = vmatprep.mubr.f32.mxu1 %v383_v29 }
  0x81   : > { %1319 = vmatmul.mubr.f32.gmra.mrb[2].mxu0 %v368_v30  ;;  %1343 = vmatmul.mubr.f32.gmra.mrb[2].mxu1 %v384_v31 }
  0x82   : > { %1321 = vmatprep.mubr.f32.mxu0 %v369_v32  ;;  %1345 = vmatprep.mubr.f32.mxu1 %v385_v33 }
  0x85   : > { %1322 = vmatmul.mubr.f32.gmra.mrb[4].mxu0 %v370_v34  ;;  %1346 = vmatmul.mubr.f32.gmra.mrb[4].mxu1 %v386_v35 }
  0x86   : > { %1324 = vmatprep.mubr.f32.mxu0 %v371_v36  ;;  %1348 = vmatprep.mubr.f32.mxu1 %v387_v37 }
  0x89   : > { %1325 = vmatmul.mubr.f32.gmra.mrb[6].mxu0 %v372_v38  ;;  %1349 = vmatmul.mubr.f32.gmra.mrb[6].mxu1 %v388_v39 }
  0x8a   : > { %1327 = vmatprep.mubr.f32.mxu0 %v373_v40  ;;  %1351 = vmatprep.mubr.f32.mxu1 %v389_v41 }
  0x8d   : > { %1328 = vmatmul.mubr.f32.gmra.mrb[8].mxu0 %v374_v42  ;;  %1352 = vmatmul.mubr.f32.gmra.mrb[8].mxu1 %v390_v43 }
  0x8e   : > { %1330 = vmatprep.mubr.f32.mxu0 %v375_v44  ;;  %1354 = vmatprep.mubr.f32.mxu1 %v391_v45 }
  0x91   : > { %1331 = vmatmul.mubr.f32.gmra.mrb[10].mxu0 %v376_v46  ;;  %1355 = vmatmul.mubr.f32.gmra.mrb[10].mxu1 %v392_v47 }
  0x92   : > { %1333 = vmatprep.mubr.f32.mxu0 %v377_v48  ;;  %1357 = vmatprep.mubr.f32.mxu1 %v393_v49 }
  0x95   : > { %1334 = vmatmul.mubr.f32.gmra.mrb[12].mxu0 %v378_v50  ;;  %1358 = vmatmul.mubr.f32.gmra.mrb[12].mxu1 %v394_v51 }
  0x96   : > { %1336 = vmatprep.mubr.f32.mxu0 %v379_v52  ;;  %1360 = vmatprep.mubr.f32.mxu1 %v395_v53 }
  0x99   : > { %1337 = vmatmul.mubr.f32.gmra.mrb[14].mxu0 %v380_v54  ;;  %1361 = vmatmul.mubr.f32.gmra.mrb[14].mxu1 %v396_v55 }
 0x150   : > { %v1317_v57 = vpop.f32.mrb[0].mxu0  ;;  %v1341_v59 = vpop.f32.mrb[0].mxu1 }
 0x151   : > { %v745_v60 = vmul.f32 %v1317_v57, %v2003_v56  ;;  %v761_v61 = vmul.f32 %v1341_v59, %v2003_v56  ;;  %v479_v62 = vpop.f32.mrb[1].mxu0  ;;  %v559_v63 = vpop.f32.mrb[1].mxu1 }
 0x152   : > { %v744_v0 = vmul.f32 %v2003_v56, %v479_v62  ;;  %v760_v1 = vmul.f32 %v2003_v56, %v559_v63 }
 0x153   : > { %v2015_v2 = vadd.f32 %v2008_v58, %v745_v60  ;;  %v2018_v3 = vadd.f32 %v2008_v58, %v761_v61 }
 0x154   : > { %v2021_v4 = vadd.f32 %v2008_v58, %v744_v0  ;;  %v2024_v5 = vadd.f32 %v2008_v58, %v760_v1  ;;  %v1320_v6 = vpop.f32.mrb[2].mxu0  ;;  %v1344_v7 = vpop.f32.mrb[2].mxu1 }
 0x155   : > { %v816_v8 = vsub.f32 0.0, %v2015_v2  ;;  %v832_v9 = vsub.f32 0.0, %v2018_v3  ;;  %v747_v10 = vmul.f32 %v1320_v6, %v2003_v56  ;;  %v763_v11 = vmul.f32 %v1344_v7, %v2003_v56  ;;  %v489_v12 = vpop.f32.mrb[3].mxu0  ;;  %v569_v13 = vpop.f32.mrb[3].mxu1 }
 0x156   : > { %v815_v14 = vsub.f32 0.0, %v2021_v4  ;;  %v831_v15 = vsub.f32 0.0, %v2024_v5  ;;  %v746_v16 = vmul.f32 %v2003_v56, %v489_v12  ;;  %v762_v17 = vmul.f32 %v2003_v56, %v569_v13 }
 0x157   : > { %v849_v18 = vmul.f32 1.442695, %v816_v8  ;;  %v881_v19 = vmul.f32 1.442695, %v832_v9  ;;  %v2035_v20 = vadd.f32 %v2008_v58, %v747_v10  ;;  %v2038_v21 = vadd.f32 %v2008_v58, %v763_v11 }
 0x158   : > { %v847_v22 = vmul.f32 1.442695, %v815_v14  ;;  %v879_v23 = vmul.f32 1.442695, %v831_v15  ;;  %v2041_v24 = vadd.f32 %v2008_v58, %v746_v16  ;;  %v2044_v25 = vadd.f32 %v2008_v58, %v762_v17  ;;  %v1323_v26 = vpop.f32.mrb[4].mxu0  ;;  %v1347_v27 = vpop.f32.mrb[4].mxu1 }
 0x159   : > { %1488 = vpow2.f32 %v849_v18  ;;  %v818_v28 = vsub.f32 0.0, %v2035_v20  ;;  %v834_v29 = vsub.f32 0.0, %v2038_v21  ;;  %v749_v30 = vmul.f32 %v1323_v26, %v2003_v56  ;;  %v499_v31 = vpop.f32.mrb[5].mxu0  ;;  %v579_v32 = vpop.f32.mrb[5].mxu1 }
 0x15a   : > { %1490 = vpow2.f32 %v881_v19  ;;  %v817_v33 = vsub.f32 0.0, %v2041_v24  ;;  %v833_v34 = vsub.f32 0.0, %v2044_v25  ;;  %v765_v35 = vmul.f32 %v1347_v27, %v2003_v56 }
 0x15b   : > { %1492 = vpow2.f32 %v847_v22  ;;  %v853_v36 = vmul.f32 1.442695, %v818_v28  ;;  %v885_v37 = vmul.f32 1.442695, %v834_v29  ;;  %v2053_v38 = vadd.f32 %v2008_v58, %v749_v30 }
 0x15c   : > { %1494 = vpow2.f32 %v879_v23  ;;  %v851_v39 = vmul.f32 1.442695, %v817_v33  ;;  %v883_v40 = vmul.f32 1.442695, %v833_v34  ;;  %v2056_v41 = vadd.f32 %v2008_v58, %v765_v35  ;;  %v1326_v42 = vpop.f32.mrb[6].mxu0  ;;  %v1350_v43 = vpop.f32.mrb[6].mxu1 }
 0x15d   : > { %1496 = vpow2.f32 %v853_v36  ;;  %v820_v44 = vsub.f32 0.0, %v2053_v38  ;;  %v748_v45 = vmul.f32 %v2003_v56, %v499_v31  ;;  %v764_v46 = vmul.f32 %v2003_v56, %v579_v32  ;;  %v509_v47 = vpop.f32.mrb[7].mxu0  ;;  %v589_v48 = vpop.f32.mrb[7].mxu1 }
 0x15e   : > { %1498 = vpow2.f32 %v885_v37  ;;  %v836_v49 = vsub.f32 0.0, %v2056_v41  ;;  %v751_v50 = vmul.f32 %v1326_v42, %v2003_v56  ;;  %v767_v51 = vmul.f32 %v1350_v43, %v2003_v56 }
 0x15f   : > { %1500 = vpow2.f32 %v851_v39  ;;  %v857_v52 = vmul.f32 1.442695, %v820_v44  ;;  %v2065_v53 = vadd.f32 %v2008_v58, %v748_v45  ;;  %v2068_v54 = vadd.f32 %v2008_v58, %v764_v46 }
 0x160   : > { %1502 = vpow2.f32 %v883_v40  ;;  %v889_v55 = vmul.f32 1.442695, %v836_v49  ;;  %v2071_v57 = vadd.f32 %v2008_v58, %v751_v50  ;;  %v2074_v59 = vadd.f32 %v2008_v58, %v767_v51  ;;  %v1329_v60 = vpop.f32.mrb[8].mxu0  ;;  %v1353_v61 = vpop.f32.mrb[8].mxu1 }
 0x161   : > { %1504 = vpow2.f32 %v857_v52  ;;  %v819_v62 = vsub.f32 0.0, %v2065_v53  ;;  %v835_v63 = vsub.f32 0.0, %v2068_v54  ;;  %v750_v0 = vmul.f32 %v2003_v56, %v509_v47  ;;  %v519_v1 = vpop.f32.mrb[9].mxu0  ;;  %v599_v6 = vpop.f32.mrb[9].mxu1 }
 0x162   : > { %1506 = vpow2.f32 %v889_v55  ;;  %v766_v7 = vmul.f32 %v2003_v56, %v589_v48  ;;  %v822_v10 = vsub.f32 0.0, %v2071_v57  ;;  %v753_v11 = vmul.f32 %v1329_v60, %v2003_v56 }
 0x163   : > { %v1489_v8 = vpop.eup %1488  ;;  %v855_v9 = vmul.f32 1.442695, %v819_v62  ;;  %v838_v14 = vsub.f32 0.0, %v2074_v59  ;;  %v2084_v15 = vadd.f32 %v2008_v58, %v750_v0  ;;  %v887_v19 = vmul.f32 1.442695, %v835_v63 }
 0x164   : > { %v1491_v12 = vpop.eup %1490  ;;  %v912_v13 = vadd.f32 1.0, %v1489_v8  ;;  %v1332_v16 = vpop.f32.mrb[10].mxu0  ;;  %v2087_v28 = vadd.f32 %v2008_v58, %v766_v7  ;;  %v769_v29 = vmul.f32 %v1353_v61, %v2003_v56  ;;  %v861_v33 = vmul.f32 1.442695, %v822_v10 }
 0x165   : > { %v1493_v17 = vpop.eup %1492  ;;  %v928_v18 = vadd.f32 1.0, %v1491_v12  ;;  %1508 = vpow2.f32 %v855_v9  ;;  %v1356_v22 = vpop.f32.mrb[10].mxu1  ;;  %v2091_v34 = vadd.f32 %v2008_v58, %v753_v11  ;;  %v893_v37 = vmul.f32 1.442695, %v838_v14 }
 0x166   : > { %v529_v23 = vpop.f32.mrb[11].mxu0  ;;  %v1495_v26 = vpop.eup %1494  ;;  %1510 = vrcp.f32 %v912_v13  ;;  %v911_v27 = vadd.f32 1.0, %v1493_v17  ;;  %v821_v39 = vsub.f32 0.0, %v2084_v15  ;;  %v2099_v45 = vadd.f32 %v2008_v58, %v769_v29 }
 0x167   : > { %v609_v30 = vpop.f32.mrb[11].mxu1  ;;  %v1497_v31 = vpop.eup %1496  ;;  %1512 = vrcp.f32 %v928_v18  ;;  %v927_v32 = vadd.f32 1.0, %v1495_v26  ;;  %v752_v46 = vmul.f32 %v2003_v56, %v519_v1  ;;  %v837_v51 = vsub.f32 0.0, %v2087_v28 }
 0x168   : > { %v1499_v35 = vpop.eup %1498  ;;  %1514 = vrcp.f32 %v911_v27  ;;  %v914_v36 = vadd.f32 1.0, %v1497_v31  ;;  %v2094_v40 = vpop.f32.mrb[12].mxu0  ;;  %v768_v52 = vmul.f32 %v2003_v56, %v599_v6  ;;  %v824_v61 = vsub.f32 0.0, %v2091_v34 }
 0x169   : > { %v2096_v42 = vpop.f32.mrb[12].mxu1  ;;  %v1501_v43 = vpop.eup %1500  ;;  %1516 = vrcp.f32 %v927_v32  ;;  %v930_v44 = vadd.f32 1.0, %v1499_v35  ;;  %v755_v62 = vmul.f32 %v1332_v16, %v2003_v56  ;;  %v859_v1 = vmul.f32 1.442695, %v821_v39 }
 0x16a   : > { %v2102_v47 = vpop.f32.mrb[13].mxu0  ;;  %v2104_v48 = vpop.f32.mrb[13].mxu1  ;;  %1518 = vrcp.f32 %v914_v36  ;;  %v913_v50 = vadd.f32 1.0, %v1501_v43  ;;  %v2111_v7 = vadd.f32 %v2008_v58, %v752_v46  ;;  %v840_v10 = vsub.f32 0.0, %v2099_v45 }
 0x16b   : > { %v1503_v49 = vpop.eup %1502  ;;  %1520 = vrcp.f32 %v930_v44  ;;  %v2119_v11 = vadd.f32 %v2008_v58, %v768_v52  ;;  %v2126_v14 = vadd.f32 %v2008_v58, %v755_v62  ;;  %v771_v16 = vmul.f32 %v1356_v22, %v2003_v56 }
 0x16c   : > { %v1505_v55 = vpop.eup %1504  ;;  %v929_v60 = vadd.f32 1.0, %v1503_v49  ;;  %1522 = vrcp.f32 %v913_v50  ;;  %v2113_v8 = vpop.f32.mrb[14].mxu0  ;;  %v754_v17 = vmul.f32 %v2003_v56, %v529_v23  ;;  %v891_v26 = vmul.f32 1.442695, %v837_v51 }
 0x16d   : > { %v1507_v63 = vpop.eup %1506  ;;  %v916_v0 = vadd.f32 1.0, %v1505_v55  ;;  %v2115_v9 = vpop.f32.mrb[14].mxu1  ;;  %v865_v27 = vmul.f32 1.442695, %v824_v61  ;;  %v770_v29 = vmul.f32 %v2003_v56, %v609_v30  ;;  %v823_v35 = vsub.f32 0.0, %v2111_v7 }
 0x16e   : > { %1524 = vrcp.f32 %v929_v60  ;;  %v932_v6 = vadd.f32 1.0, %v1507_v63  ;;  %v2121_v12 = vpop.f32.mrb[15].mxu0  ;;  %v2123_v13 = vpop.f32.mrb[15].mxu1  ;;  %v2133_v36 = vadd.f32 %v2008_v58, %v771_v16  ;;  %v839_v23 = vsub.f32 0.0, %v2119_v11 }
 0x16f   : > { %1526 = vrcp.f32 %v916_v0  ;;  %v1509_v18 = vpop.eup %1508  ;;  %v2138_v43 = vadd.f32 %v2008_v58, %v754_v17  ;;  %v897_v46 = vmul.f32 1.442695, %v840_v10  ;;  %v863_v52 = vmul.f32 1.442695, %v823_v35 }
 0x170   : > { %1528 = vrcp.f32 %v932_v6  ;;  %v1511_v31 = vpop.eup %1510  ;;  %v915_v32 = vadd.f32 1.0, %v1509_v18 }
 0x171   : > { %1530 = vpow2.f32 %v887_v19  ;;  %v1513_v39 = vpop.eup %1512  ;;  %v1008_v22 = vmul.f32 %v1511_v31, %v2015_v2  ;;  %v826_v19 = vsub.f32 0.0, %v2126_v14  ;;  %v825_v55 = vsub.f32 0.0, %v2138_v43 }
 0x172   : > { %1532 = vpow2.f32 %v861_v33  ;;  %v1515_v44 = vpop.eup %1514  ;;  %v1024_v30 = vmul.f32 %v1513_v39, %v2018_v3  ;;  %v842_v33 = vsub.f32 0.0, %v2133_v36  ;;  %v2150_v3 = vadd.f32 %v2008_v58, %v770_v29 }
 0x173   : > { %1534 = vrcp.f32 %v915_v32  ;;  %v1517_v49 = vpop.eup %1516  ;;  %1040 = vst [vmem:[%s2144_s21 + $0x8] sm:$0xff] %v1008_v22  ;;  %v1007_v2 = vmul.f32 %v1515_v44, %v2021_v4  ;;  %v869_v63 = vmul.f32 1.442695, %v826_v19  ;;  %v867_v16 = vmul.f32 1.442695, %v825_v55 }
 0x174   : > { %1536 = vpow2.f32 %v893_v37  ;;  %v1519_v50 = vpop.eup %1518  ;;  %1056 = vst [vmem:[%s2144_s21 + $0x88] sm:$0xff] %v1024_v30  ;;  %v1023_v51 = vmul.f32 %v1517_v49, %v2024_v5  ;;  %v895_v37 = vmul.f32 1.442695, %v839_v23  ;;  %v841_v6 = vsub.f32 0.0, %v2150_v3 }
 0x175   : > { %1538 = vpow2.f32 %v859_v1  ;;  %v1521_v60 = vpop.eup %1520  ;;  %1039 = vst [vmem:[%s2144_s21] sm:$0xff] %v1007_v2  ;;  %v1010_v4 = vmul.f32 %v1519_v50, %v2035_v20  ;;  %v901_v1 = vmul.f32 1.442695, %v842_v33  ;;  %v756_v39 = vmul.f32 %v2003_v56, %v2102_v47 }
 0x176   : > { %1540 = vpow2.f32 %v891_v26  ;;  %v1523_v61 = vpop.eup %1522  ;;  %1055 = vst [vmem:[%s2144_s21 + $0x80] sm:$0xff] %v1023_v51  ;;  %v1026_v62 = vmul.f32 %v1521_v60, %v2038_v21  ;;  %v757_v21 = vmul.f32 %v2094_v40, %v2003_v56  ;;  %v773_v40 = vmul.f32 %v2096_v42, %v2003_v56 }
 0x177   : > { %1542 = vpow2.f32 %v865_v27  ;;  %1042 = vst [vmem:[%s2144_s21 + $0x18] sm:$0xff] %v1010_v4  ;;  %v1009_v5 = vmul.f32 %v1523_v61, %v2041_v24  ;;  %v772_v42 = vmul.f32 %v2003_v56, %v2104_v48  ;;  %v775_v2 = vmul.f32 %v2115_v9, %v2003_v56 }
 0x178   : > { %v1525_v0 = vpop.eup %1524  ;;  %1544 = vpow2.f32 %v897_v46  ;;  %1058 = vst [vmem:[%s2144_s21 + $0x98] sm:$0xff] %v1026_v62  ;;  %v2184_v46 = vadd.f32 %v2008_v58, %v773_v40  ;;  %v2192_v50 = vadd.f32 %v2008_v58, %v756_v39  ;;  %v758_v51 = vmul.f32 %v2003_v56, %v2121_v12 }
 0x179   : > { %v1527_v20 = vpop.eup %1526  ;;  %v1025_v10 = vmul.f32 %v1525_v0, %v2044_v25  ;;  %1546 = vpow2.f32 %v863_v52  ;;  %1041 = vst [vmem:[%s2144_s21 + $0x10] sm:$0xff] %v1009_v5  ;;  %v899_v25 = vmul.f32 1.442695, %v841_v6  ;;  %v2197_v55 = vadd.f32 %v2008_v58, %v772_v42 }
 0x17a   : > { %v1529_v17 = vpop.eup %1528  ;;  %v1012_v18 = vmul.f32 %v1527_v20, %v2053_v38  ;;  %1548 = vpow2.f32 %v895_v37  ;;  %v2175_v38 = vadd.f32 %v2008_v58, %v757_v21  ;;  %v774_v60 = vmul.f32 %v2003_v56, %v2123_v13 }
 0x17b   : > { %v1531_v24 = vpop.eup %1530  ;;  %1057 = vst [vmem:[%s2144_s21 + $0x90] sm:$0xff] %v1025_v10  ;;  %v1028_v26 = vmul.f32 %v1529_v17, %v2056_v41  ;;  %1550 = vpow2.f32 %v869_v63  ;;  %v844_v37 = vsub.f32 0.0, %v2184_v46  ;;  %v2206_v0 = vadd.f32 %v2008_v58, %v775_v2 }
 0x17c   : > { %v1533_v27 = vpop.eup %1532  ;;  %1044 = vst [vmem:[%s2144_s21 + $0x28] sm:$0xff] %v1012_v18  ;;  %v931_v29 = vadd.f32 1.0, %v1531_v24  ;;  %1552 = vpow2.f32 %v901_v1  ;;  %v828_v47 = vsub.f32 0.0, %v2175_v38  ;;  %v2210_v13 = vadd.f32 %v2008_v58, %v758_v51 }
 0x17d   : > { %v1535_v31 = vpop.eup %1534  ;;  %1060 = vst [vmem:[%s2144_s21 + $0xa8] sm:$0xff] %v1028_v26  ;;  %v918_v32 = vadd.f32 1.0, %v1533_v27  ;;  %1554 = vpow2.f32 %v867_v16  ;;  %v843_v10 = vsub.f32 0.0, %v2197_v55  ;;  %v2214_v16 = vadd.f32 %v2008_v58, %v774_v60 }
 0x17e   : > { %v1537_v35 = vpop.eup %1536  ;;  %v1011_v41 = vmul.f32 %v1535_v31, %v2065_v53  ;;  %1556 = vrcp.f32 %v931_v29  ;;  %v759_v53 = vmul.f32 %v2113_v8, %v2003_v56  ;;  %v873_v63 = vmul.f32 1.442695, %v828_v47 }
 0x17f   : > { %v1539_v22 = vpop.eup %1538  ;;  %1558 = vrcp.f32 %v918_v32  ;;  %v934_v23 = vadd.f32 1.0, %v1537_v35  ;;  %v827_v56 = vsub.f32 0.0, %v2192_v50  ;;  %v905_v18 = vmul.f32 1.442695, %v844_v37 }
 0x180   : > { %v1541_v44 = vpop.eup %1540  ;;  %1043 = vst [vmem:[%s2144_s21 + $0x20] sm:$0xff] %v1011_v41  ;;  %v917_v30 = vadd.f32 1.0, %v1539_v22  ;;  %1560 = vpow2.f32 %v899_v25  ;;  %v2203_v61 = vadd.f32 %v2008_v58, %v759_v53  ;;  %v846_v29 = vsub.f32 0.0, %v2206_v0 }
 0x181   : > { %v1543_v19 = vpop.eup %1542  ;;  %1562 = vrcp.f32 %v934_v23  ;;  %v933_v49 = vadd.f32 1.0, %v1541_v44  ;;  %v871_v58 = vmul.f32 1.442695, %v827_v56  ;;  %v829_v31 = vsub.f32 0.0, %v2210_v13 }
 0x182   : > { %v1545_v33 = vpop.eup %1544  ;;  %1564 = vrcp.f32 %v917_v30  ;;  %v920_v48 = vadd.f32 1.0, %v1543_v19  ;;  %v830_v24 = vsub.f32 0.0, %v2203_v61  ;;  %v903_v41 = vmul.f32 1.442695, %v843_v10 }
 0x183   : > { %v1547_v52 = vpop.eup %1546  ;;  %1566 = vrcp.f32 %v933_v49  ;;  %v936_v8 = vadd.f32 1.0, %v1545_v33  ;;  %v845_v39 = vsub.f32 0.0, %v2214_v16  ;;  %v909_v44 = vmul.f32 1.442695, %v846_v29 }
 0x184   : > { %v1549_v4 = vpop.eup %1548  ;;  %1568 = vrcp.f32 %v920_v48  ;;  %v919_v9 = vadd.f32 1.0, %v1547_v52  ;;  %v877_v23 = vmul.f32 1.442695, %v830_v24  ;;  %v875_v19 = vmul.f32 1.442695, %v829_v31 }
 0x185   : > { %v1551_v62 = vpop.eup %1550  ;;  %1570 = vrcp.f32 %v936_v8  ;;  %v935_v12 = vadd.f32 1.0, %v1549_v4  ;;  %v907_v47 = vmul.f32 1.442695, %v845_v39 }
 0x186   : > { %v1553_v5 = vpop.eup %1552  ;;  %1572 = vrcp.f32 %v919_v9  ;;  %v922_v1 = vadd.f32 1.0, %v1551_v62 }
 0x187   : > { %v1555_v6 = vpop.eup %1554  ;;  %1574 = vrcp.f32 %v935_v12  ;;  %v938_v20 = vadd.f32 1.0, %v1553_v5 }
 0x188   : > { %v1557_v21 = vpop.eup %1556  ;;  %1576 = vrcp.f32 %v922_v1  ;;  %v921_v17 = vadd.f32 1.0, %v1555_v6 }
 0x189   : > { %v1559_v26 = vpop.eup %1558  ;;  %v1027_v27 = vmul.f32 %v1557_v21, %v2068_v54  ;;  %1578 = vrcp.f32 %v938_v20 }
 0x18a   : > { %v1561_v25 = vpop.eup %1560  ;;  %v1014_v40 = vmul.f32 %v1559_v26, %v2071_v57  ;;  %1580 = vrcp.f32 %v921_v17 }
 0x18b   : > { %v1563_v32 = vpop.eup %1562  ;;  %1059 = vst [vmem:[%s2144_s21 + $0xa0] sm:$0xff] %v1027_v27  ;;  %v937_v35 = vadd.f32 1.0, %v1561_v25  ;;  %1582 = vpow2.f32 %v873_v63 }
 0x18c   : > { %v1565_v54 = vpop.eup %1564  ;;  %1046 = vst [vmem:[%s2144_s21 + $0x38] sm:$0xff] %v1014_v40  ;;  %v1030_v22 = vmul.f32 %v1563_v32, %v2074_v59  ;;  %1584 = vpow2.f32 %v905_v18 }
 0x18d   : > { %v1567_v57 = vpop.eup %1566  ;;  %v1013_v42 = vmul.f32 %v1565_v54, %v2084_v15  ;;  %1586 = vrcp.f32 %v937_v35 }
 0x18e   : > { %v1569_v30 = vpop.eup %1568  ;;  %1062 = vst [vmem:[%s2144_s21 + $0xb8] sm:$0xff] %v1030_v22  ;;  %v1029_v53 = vmul.f32 %v1567_v57, %v2087_v28  ;;  %1588 = vpow2.f32 %v871_v58 }
 0x18f   : > { %v1571_v49 = vpop.eup %1570  ;;  %1045 = vst [vmem:[%s2144_s21 + $0x30] sm:$0xff] %v1013_v42  ;;  %v1016_v59 = vmul.f32 %v1569_v30, %v2091_v34  ;;  %1590 = vpow2.f32 %v903_v41 }
 0x190   : > { %v1573_v2 = vpop.eup %1572  ;;  %1061 = vst [vmem:[%s2144_s21 + $0xb0] sm:$0xff] %v1029_v53  ;;  %v1032_v15 = vmul.f32 %v1571_v49, %v2099_v45  ;;  %1592 = vpow2.f32 %v877_v23 }
 0x191   : > { %v1575_v33 = vpop.eup %1574  ;;  %1048 = vst [vmem:[%s2144_s21 + $0x48] sm:$0xff] %v1016_v59  ;;  %v1015_v28 = vmul.f32 %v1573_v2, %v2111_v7  ;;  %1594 = vpow2.f32 %v909_v44 }
 0x192   : > { %v1577_v48 = vpop.eup %1576  ;;  %1064 = vst [vmem:[%s2144_s21 + $0xc8] sm:$0xff] %v1032_v15  ;;  %v1031_v34 = vmul.f32 %v1575_v33, %v2119_v11  ;;  %1596 = vpow2.f32 %v875_v19 }
 0x193   : > { %v1579_v51 = vpop.eup %1578  ;;  %1047 = vst [vmem:[%s2144_s21 + $0x40] sm:$0xff] %v1015_v28  ;;  %v1018_v52 = vmul.f32 %v1577_v48, %v2126_v14  ;;  %1598 = vpow2.f32 %v907_v47 }
 0x194   : > { %v1581_v45 = vpop.eup %1580  ;;  %1063 = vst [vmem:[%s2144_s21 + $0xc0] sm:$0xff] %v1031_v34  ;;  %v1034_v8 = vmul.f32 %v1579_v51, %v2133_v36 }
 0x195   : > { %v1583_v60 = vpop.eup %1582  ;;  %1050 = vst [vmem:[%s2144_s21 + $0x58] sm:$0xff] %v1018_v52  ;;  %v1017_v7 = vmul.f32 %v1581_v45, %v2138_v43 }
 0x196   : > { %v1585_v4 = vpop.eup %1584  ;;  %1066 = vst [vmem:[%s2144_s21 + $0xd8] sm:$0xff] %v1034_v8  ;;  %v924_v9 = vadd.f32 1.0, %v1583_v60 }
 0x197   : > { %v1587_v11 = vpop.eup %1586  ;;  %1049 = vst [vmem:[%s2144_s21 + $0x50] sm:$0xff] %v1017_v7  ;;  %v940_v37 = vadd.f32 1.0, %v1585_v4 }
 0x198   : > { %v1589_v62 = vpop.eup %1588  ;;  %v1033_v12 = vmul.f32 %v1587_v11, %v2150_v3  ;;  %1600 = vrcp.f32 %v924_v9 }
 0x199   : > { %v1591_v14 = vpop.eup %1590  ;;  %1602 = vrcp.f32 %v940_v37  ;;  %v923_v63 = vadd.f32 1.0, %v1589_v62 }
 0x19a   : > { %v1593_v5 = vpop.eup %1592  ;;  %1065 = vst [vmem:[%s2144_s21 + $0xd0] sm:$0xff] %v1033_v12  ;;  %v939_v36 = vadd.f32 1.0, %v1591_v14 }
 0x19b   : > { %v1595_v1 = vpop.eup %1594  ;;  %1604 = vrcp.f32 %v923_v63  ;;  %v926_v56 = vadd.f32 1.0, %v1593_v5 }
 0x19c   : > { %v1597_v43 = vpop.eup %1596  ;;  %1606 = vrcp.f32 %v939_v36  ;;  %v942_v6 = vadd.f32 1.0, %v1595_v1 }
 0x19d   : > { %v1599_v20 = vpop.eup %1598  ;;  %1608 = vrcp.f32 %v926_v56  ;;  %v925_v10 = vadd.f32 1.0, %v1597_v43 }
 0x19e   : > { %1610 = vrcp.f32 %v942_v6  ;;  %v941_v3 = vadd.f32 1.0, %v1599_v20 }
 0x19f   : > { %1612 = vrcp.f32 %v925_v10 }
 0x1a0   : > { %1614 = vrcp.f32 %v941_v3 }
 0x1a2   : > { %v1601_v21 = vpop.eup %1600 }
 0x1a3   : > { %v1603_v17 = vpop.eup %1602  ;;  %v1020_v18 = vmul.f32 %v1601_v21, %v2175_v38 }
 0x1a4   : > { %v1036_v24 = vmul.f32 %v1603_v17, %v2184_v46 }
 0x1a5   : > { %v1605_v26 = vpop.eup %1604  ;;  %1052 = vst [vmem:[%s2144_s21 + $0x68] sm:$0xff] %v1020_v18 }
 0x1a6   : > { %v1607_v27 = vpop.eup %1606  ;;  %1068 = vst [vmem:[%s2144_s21 + $0xe8] sm:$0xff] %v1036_v24  ;;  %v1019_v29 = vmul.f32 %v1605_v26, %v2192_v50 }
 0x1a7   : > { %v1609_v25 = vpop.eup %1608  ;;  %v1035_v40 = vmul.f32 %v1607_v27, %v2197_v55 }
 0x1a8   : > { %v1611_v58 = vpop.eup %1610  ;;  %1051 = vst [vmem:[%s2144_s21 + $0x60] sm:$0xff] %v1019_v29  ;;  %v1022_v38 = vmul.f32 %v1609_v25, %v2203_v61 }
 0x1a9   : > { %v1613_v46 = vpop.eup %1612  ;;  %1067 = vst [vmem:[%s2144_s21 + $0xe0] sm:$0xff] %v1035_v40  ;;  %v1038_v31 = vmul.f32 %v1611_v58, %v2206_v0 }
 0x1aa   : > { %v1615_v32 = vpop.eup %1614  ;;  %1054 = vst [vmem:[%s2144_s21 + $0x78] sm:$0xff] %v1022_v38  ;;  %v1021_v50 = vmul.f32 %v1613_v46, %v2210_v13 }
 0x1ab   : > { %1070 = vst [vmem:[%s2144_s21 + $0xf8] sm:$0xff] %v1038_v31  ;;  %v1037_v55 = vmul.f32 %v1615_v32, %v2214_v16 }
 0x1ac   : > { %1053 = vst [vmem:[%s2144_s21 + $0x70] sm:$0xff] %v1021_v50 }
 0x1ad   : > { %1069 = vst [vmem:[%s2144_s21 + $0xf0] sm:$0xff] %v1037_v55 }
 0x1ae   : > { %1687 = shalt.err (!%p1684_p5)
}
 0x1af   : > { %s1688_s8 = scalar_lea.hbm %s2263_s18, 4096  ;;  %s1692_s27 = scalar_lea.hbm %s2322_s4, 8192 }
 0x1b0   : > { %p1689_p9 = scmp.ne.s32.totalorder %s2263_s18, %s1688_s8  ;;  %p1693_p3 = scmp.lt.u32.totalorder %s2263_s18, %s2322_s4 }
 0x1b1   : > { %p1694_p7 = scmp.lt.u32.totalorder %s1692_s27, %s1688_s8  ;;  %p1696_p4 = scmp.lt.u32.totalorder %s1688_s8, %s2263_s18 }
 0x1b2   : > { %p1690_p1 = pnand %p1689_p9, %p1893_p10 }
 0x1b3   : > { %p1695_p13 = por %p1694_p7, %p1693_p3 }
 0x1b4   : > { %p1691_p2 = pneg %p1690_p1 }
 0x1b5   : > { %p1697_p6 = por %p1696_p4, %p1695_p13 }
 0x1b7   : > { %p1698_p8 = pnand %p1697_p6, %p1691_p2 }
 0x1b9   : > { %1701 = shalt.err (!%p1698_p8)
}
 0x1ba   : > { %s1767_s22 = smov 128   ;;  %s1768_s6 = smov 8  }
 0x1bb   : > { %1417 = dma.vmem_to_hbm [thread:$0]  (%p1893_p10), %s2265_s28, 4096, %s2263_s18, %s1072_s9, %s1767_s22, %s1767_s22, %s1768_s6  }
 0x1bc PF: > { %s1101_s29 = sand.u32 1, %s1740_s15   ;;  %p2340_p12 = scmp.ne.s32.totalorder %s2330_s26, 0 }
 0x1bd   : > { %p2341_p11 = scmp.ge.s32.totalorder %s1760_s20, 2  ;;  %s1102_s11 = scalar_lea.sflag [#allocation5], %s1101_s29 }
 0x1bf   : > { %p1428_p0 = pnand %p2341_p11, %p2340_p12 }
 0x1c1   : > { %1735 = dma.done.wait (!%p1428_p0), %s1102_s11, 4096  }
 0x1c2   : > { %1737 = vsyncadd (!%p1428_p0), %s1102_s11, 4294963200  ;;  %s21_s20 = sadd.s32 1, %s1760_s20   ;;  %s2342_s15 = smov %s1744_s16 }
 0x1c3   : > { %p18_p5 = scmp.ge.s32.totalorder %s21_s20, 4   ;;  %s2343_s16 = smov %s1748_s17 }
 0x1c4   : > { %s2344_s17 = smov %s1902_s10  ;;  %s2345_s18 = smov %s1756_s19 }
 0x1c5   : > { %s2346_s19 = smov %s2348_s5  ;;  %20 = sbr.rel (!%p18_p5) target bundleno = 7 (0x7), region = 100 }
 0x1cc   :  { %1107 = vsyncpa [#allocation4], 1 }
 0x1cd   :  { %1109 = vsyncpa [#allocation4 + $0x1], 1 }
 0x1ce   :  { %1110 = vsyncpa [#allocation7], 1 }
 0x1cf   :  { %1111 = vsyncpa [#allocation5], 1 }
 0x1d0   :  { %1113 = vsyncpa [#allocation5 + $0x1], 1 }

</bundles_post_ra>
